<compile_context>
chip_gen: v5e
topology: v5e:2x2
jax: 0.10.0
libtpu: 0.0.40
codegen_flags: <defaults>
</compile_context>

<pallas_src>
import jax
import jax.numpy as jnp
from jax.experimental import pallas as pl
from jax.experimental.pallas import tpu as pltpu


def _round_up(v, m):
    return ((v + m - 1) // m) * m


def cfconv_kernel(h_ref, x_ref, w_in_ref, b_in_ref, mu_ref,
                  w_out_ref, b_out_ref, gamma_ref, o_ref):
    # h_ref:     (tm, F_in)   bf16
    # x_ref:     (tm, 1)      f32
    # w_in_ref:  (F_in, Kp)   bf16,  b_in_ref: (1, Kp) f32
    # mu_ref:    (1, Kp)      f32,   gamma_ref: (1, 1) f32 in SMEM
    # w_out_ref: (Kp, F_out)  bf16,  b_out_ref: (1, F_out) f32
    # o_ref:     (tm, F_out)  f32
    gamma = gamma_ref[0, 0]                          # scalar from SMEM

    # mlp_in: Linear(in_features -> K), bf16 MXU, f32 accumulate, f32 bias add
    hk = jnp.dot(h_ref[...], w_in_ref[...],
                 preferred_element_type=jnp.float32) + b_in_ref[...]   # (tm, Kp) f32

    # RBF in f32: diff is cancellation-sensitive, exp on EUP (free slot vs VPU/MXU)
    diff = x_ref[...] - mu_ref[...]                  # (tm, Kp) f32
    rbf = jnp.exp(diff * diff * (-gamma))            # (tm, Kp) f32

    # elementwise filter in f32, single bf16 cast feeding the second MXU matmul
    prod = (hk * rbf).astype(jnp.bfloat16)           # (tm, Kp) bf16

    # mlp_out: Linear(K -> F_out) + SiLU, f32 accumulate / f32 epilogue
    y = jnp.dot(prod, w_out_ref[...],
                preferred_element_type=jnp.float32) + b_out_ref[...]   # (tm, F_out)
    o_ref[...] = y * jax.nn.sigmoid(y)               # SiLU


def cfconv(h, x, params, *, tile_m=512):
    """h: (B, N, F_in), x: (B, N, 1) -> (B, N, F_out) float32."""
    w_in, b_in, mu, gamma, w_out, b_out = params
    B, N, F_in = h.shape
    M = B * N
    K = mu.shape[0]
    F_out = w_out.shape[1]

    # --- pad the RBF/channel axis K -> multiple of 128 (300 -> 384) ---
    # Zero pad on w_in / b_in makes hk == 0 on padded columns, so they contribute
    # nothing regardless of the padded mu values; w_out pad rows are 0 too.
    Kp = _round_up(K, 128)
    pad_k = Kp - K
    w_in_p = jnp.pad(w_in, ((0, 0), (0, pad_k))).astype(jnp.bfloat16)
    b_in_p = jnp.pad(b_in, (0, pad_k)).astype(jnp.float32).reshape(1, Kp)
    mu_p = jnp.pad(mu, (0, pad_k)).astype(jnp.float32).reshape(1, Kp)
    w_out_p = jnp.pad(w_out, ((0, pad_k), (0, 0))).astype(jnp.bfloat16)
    b_out_p = b_out.astype(jnp.float32).reshape(1, F_out)
    gamma_p = jnp.asarray(gamma, jnp.float32).reshape(1, 1)

    # --- row tiling: large tiles, pad M instead of asserting divisibility ---
    tm = min(tile_m, _round_up(M, 16))
    tm = _round_up(tm, 16)                           # multiple of 16 (bf16 sublane pack)
    grid = pl.cdiv(M, tm)
    M_pad = grid * tm

    h2 = h.reshape(M, F_in).astype(jnp.bfloat16)
    x2 = x.reshape(M, 1).astype(jnp.float32)
    if M_pad != M:
        h2 = jnp.pad(h2, ((0, M_pad - M), (0, 0)))
        x2 = jnp.pad(x2, ((0, M_pad - M), (0, 0)))

    out = pl.pallas_call(
        cfconv_kernel,
        out_shape=jax.ShapeDtypeStruct((M_pad, F_out), jnp.float32),
        grid_spec=pltpu.PrefetchScalarGridSpec(
            num_scalar_prefetch=0,
            grid=(grid,),
            in_specs=[
                pl.BlockSpec((tm, F_in), lambda i: (i, 0)),         # h rows (bf16)
                pl.BlockSpec((tm, 1), lambda i: (i, 0)),            # x rows (f32)
                pl.BlockSpec((F_in, Kp), lambda i: (0, 0)),         # W_in (bf16)
                pl.BlockSpec((1, Kp), lambda i: (0, 0)),            # b_in
                pl.BlockSpec((1, Kp), lambda i: (0, 0)),            # mu
                pl.BlockSpec((Kp, F_out), lambda i: (0, 0)),        # W_out (bf16)
                pl.BlockSpec((1, F_out), lambda i: (0, 0)),         # b_out
                pl.BlockSpec(memory_space=pltpu.MemorySpace.SMEM),  # gamma scalar
            ],
            out_specs=pl.BlockSpec((tm, F_out), lambda i: (i, 0)),
        ),
        compiler_params=pltpu.CompilerParams(
            dimension_semantics=("parallel",)),
    )(h2, x2, w_in_p, b_in_p, mu_p, w_out_p, b_out_p, gamma_p)

    return out[:M].reshape(B, N, F_out)


def init_params(key, in_features, out_features, kernel_dim=300):
    """Deterministic synthetic parameters (shapes match the PyTorch module)."""
    k1, k2, k3, k4 = jax.random.split(key, 4)
    s_in = 1.0 / jnp.sqrt(in_features)
    w_in = jax.random.uniform(k1, (in_features, kernel_dim), jnp.float32, -s_in, s_in)
    b_in = jax.random.uniform(k2, (kernel_dim,), jnp.float32, -s_in, s_in)
    s_out = 1.0 / jnp.sqrt(kernel_dim)
    w_out = jax.random.uniform(k3, (kernel_dim, out_features), jnp.float32, -s_out, s_out)
    b_out = jax.random.uniform(k4, (out_features,), jnp.float32, -s_out, s_out)
    mu = jnp.linspace(0.0, 30.0, kernel_dim).astype(jnp.float32)
    gamma = jnp.float32(10.0)
    return w_in, b_in, mu, gamma, w_out, b_out


def cfconv_ref(h, x, params):
    """Pure-JAX f32 reference of the PyTorch forward."""
    w_in, b_in, mu, gamma, w_out, b_out = params
    hk = h @ w_in + b_in
    rbf = jnp.exp(-jnp.square(x - mu) * gamma)
    y = (hk * rbf) @ w_out + b_out
    return y * jax.nn.sigmoid(y)


if __name__ == "__main__":
    B, N = 2, 100              # 200 rows: exercises grid > 1 + padded remainder tile
    in_features, out_features = 32, 16
    kernel_dim = 300           # RBF default: len(linspace(0, 30, 300))

    key = jax.random.PRNGKey(0)
    kp, kh, kx = jax.random.split(key, 3)
    params = init_params(kp, in_features, out_features, kernel_dim)

    h = jax.random.normal(kh, (B, N, in_features), jnp.float32)
    x = jax.random.uniform(kx, (B, N, 1), jnp.float32, 0.0, 5.0)  # distances

    # small explicit tile for the demo (default tile_m=512 is the perf setting)
    out = cfconv(h, x, params, tile_m=64)
    out = jax.block_until_ready(out)

    ref = cfconv_ref(h, x, params)
    assert out.shape == (B, N, out_features)
    # bf16 inputs/weights on the MXU path -> looser tolerance than pure f32
    assert jnp.allclose(out, ref, atol=2e-2, rtol=2e-2), "mismatch vs reference"

    print("KERNEL_OK")
</pallas_src>

<mosaic_0001>
module attributes {stable_mosaic.version = 11 : i64} {
  func.func @cfconv_kernel(%arg0: i32, %arg1: memref<64x32xbf16, #tpu.memory_space<vmem>>, %arg2: memref<64x1xf32, #tpu.memory_space<vmem>>, %arg3: memref<32x384xbf16, #tpu.memory_space<vmem>>, %arg4: memref<1x384xf32, #tpu.memory_space<vmem>>, %arg5: memref<1x384xf32, #tpu.memory_space<vmem>>, %arg6: memref<384x16xbf16, #tpu.memory_space<vmem>>, %arg7: memref<1x16xf32, #tpu.memory_space<vmem>>, %arg8: memref<1x1xf32, #tpu.memory_space<smem>>, %arg9: memref<64x16xf32, #tpu.memory_space<vmem>>) attributes {dimension_semantics = [#tpu.dimension_semantics<parallel>], iteration_bounds = array<i64: 4>, scalar_prefetch = 0 : i64, scratch_operands = 0 : i64, tpu.core_type = #tpu.core_type<tc>, window_params = [{transform_indices = @transform_0, window_bounds = array<i64: 64, 32>}, {transform_indices = @transform_1, window_bounds = array<i64: 64, 1>}, {pipeline_mode = #tpu.pipeline_mode<synchronous>, transform_indices = @transform_2, window_bounds = array<i64: 32, 384>}, {pipeline_mode = #tpu.pipeline_mode<synchronous>, transform_indices = @transform_3, window_bounds = array<i64: 1, 384>}, {pipeline_mode = #tpu.pipeline_mode<synchronous>, transform_indices = @transform_4, window_bounds = array<i64: 1, 384>}, {pipeline_mode = #tpu.pipeline_mode<synchronous>, transform_indices = @transform_5, window_bounds = array<i64: 384, 16>}, {pipeline_mode = #tpu.pipeline_mode<synchronous>, transform_indices = @transform_6, window_bounds = array<i64: 1, 16>}, {transform_indices = @transform_7, window_bounds = array<i64: 1, 1>}, {transform_indices = @transform_8, window_bounds = array<i64: 64, 16>}]} {
    %c0 = arith.constant 0 : index
    %c0_0 = arith.constant 0 : index
    %0 = memref.load %arg8[%c0, %c0_0] : memref<1x1xf32, #tpu.memory_space<smem>>
    %c0_1 = arith.constant 0 : index
    %c0_2 = arith.constant 0 : index
    %1 = vector.load %arg1[%c0_1, %c0_2] : memref<64x32xbf16, #tpu.memory_space<vmem>>, vector<64x32xbf16>
    %c0_3 = arith.constant 0 : index
    %c0_4 = arith.constant 0 : index
    %2 = vector.load %arg3[%c0_3, %c0_4] : memref<32x384xbf16, #tpu.memory_space<vmem>>, vector<32x384xbf16>
    %cst = arith.constant dense<0.000000e+00> : vector<64x384xf32>
    %3 = tpu.matmul %1, %2, %cst {dimension_numbers = #tpu.dot_dimension_numbers<[1], [0], [0], [1], [0, 0, 1, 1], [], []>} : vector<64x32xbf16>, vector<32x384xbf16>, vector<64x384xf32> -> vector<64x384xf32>
    %c0_5 = arith.constant 0 : index
    %c0_6 = arith.constant 0 : index
    %4 = vector.load %arg4[%c0_5, %c0_6] : memref<1x384xf32, #tpu.memory_space<vmem>>, vector<1x384xf32>
    %5 = vector.broadcast %4 : vector<1x384xf32> to vector<64x384xf32>
    %6 = arith.addf %3, %5 : vector<64x384xf32>
    %c0_7 = arith.constant 0 : index
    %c0_8 = arith.constant 0 : index
    %7 = vector.load %arg2[%c0_7, %c0_8] : memref<64x1xf32, #tpu.memory_space<vmem>>, vector<64x1xf32>
    %c0_9 = arith.constant 0 : index
    %c0_10 = arith.constant 0 : index
    %8 = vector.load %arg5[%c0_9, %c0_10] : memref<1x384xf32, #tpu.memory_space<vmem>>, vector<1x384xf32>
    %9 = vector.broadcast %7 : vector<64x1xf32> to vector<64x384xf32>
    %10 = vector.broadcast %8 : vector<1x384xf32> to vector<64x384xf32>
    %11 = arith.subf %9, %10 : vector<64x384xf32>
    %12 = arith.mulf %11, %11 : vector<64x384xf32>
    %cst_11 = arith.constant 0.000000e+00 : f32
    %13 = arith.subf %cst_11, %0 : f32
    %14 = vector.broadcast %13 : f32 to vector<64x384xf32>
    %15 = arith.mulf %12, %14 : vector<64x384xf32>
    %16 = math.exp %15 : vector<64x384xf32>
    %17 = arith.mulf %6, %16 : vector<64x384xf32>
    %18 = arith.truncf %17 : vector<64x384xf32> to vector<64x384xbf16>
    %c0_12 = arith.constant 0 : index
    %c0_13 = arith.constant 0 : index
    %19 = vector.load %arg6[%c0_12, %c0_13] : memref<384x16xbf16, #tpu.memory_space<vmem>>, vector<384x16xbf16>
    %cst_14 = arith.constant dense<0.000000e+00> : vector<64x16xf32>
    %20 = tpu.matmul %18, %19, %cst_14 {dimension_numbers = #tpu.dot_dimension_numbers<[1], [0], [0], [1], [0, 0, 1, 1], [], []>} : vector<64x384xbf16>, vector<384x16xbf16>, vector<64x16xf32> -> vector<64x16xf32>
    %c0_15 = arith.constant 0 : index
    %c0_16 = arith.constant 0 : index
    %21 = vector.load %arg7[%c0_15, %c0_16] : memref<1x16xf32, #tpu.memory_space<vmem>>, vector<1x16xf32>
    %22 = vector.broadcast %21 : vector<1x16xf32> to vector<64x16xf32>
    %23 = arith.addf %20, %22 : vector<64x16xf32>
    %24 = arith.negf %23 : vector<64x16xf32>
    %25 = math.exp %24 : vector<64x16xf32>
    %cst_17 = arith.constant 1.000000e+00 : f32
    %26 = vector.broadcast %cst_17 : f32 to vector<64x16xf32>
    %27 = arith.addf %26, %25 : vector<64x16xf32>
    %28 = arith.divf %26, %27 : vector<64x16xf32>
    %29 = arith.mulf %23, %28 : vector<64x16xf32>
    %c0_18 = arith.constant 0 : index
    %c0_19 = arith.constant 0 : index
    %30 = vector.load %arg9[%c0_18, %c0_19] : memref<64x16xf32, #tpu.memory_space<vmem>>, vector<64x16xf32>
    tpu.vector_store %arg9[%c0_18, %c0_19], %29 {strides = array<i32>} : memref<64x16xf32, #tpu.memory_space<vmem>>, vector<64x16xf32>,
    return
  }
  func.func @transform_0(%arg0: i32) -> (i32, i32) {
    %c0_i32 = arith.constant 0 : i32
    %c0_i32_0 = arith.constant 0 : i32
    return %arg0, %c0_i32 : i32, i32
  }
  func.func @transform_1(%arg0: i32) -> (i32, i32) {
    %c0_i32 = arith.constant 0 : i32
    %c0_i32_0 = arith.constant 0 : i32
    return %arg0, %c0_i32 : i32, i32
  }
  func.func @transform_2(%arg0: i32) -> (i32, i32) {
    %c0_i32 = arith.constant 0 : i32
    %c0_i32_0 = arith.constant 0 : i32
    %c0_i32_1 = arith.constant 0 : i32
    return %c0_i32, %c0_i32_0 : i32, i32
  }
  func.func @transform_3(%arg0: i32) -> (i32, i32) {
    %c0_i32 = arith.constant 0 : i32
    %c0_i32_0 = arith.constant 0 : i32
    %c0_i32_1 = arith.constant 0 : i32
    return %c0_i32, %c0_i32_0 : i32, i32
  }
  func.func @transform_4(%arg0: i32) -> (i32, i32) {
    %c0_i32 = arith.constant 0 : i32
    %c0_i32_0 = arith.constant 0 : i32
    %c0_i32_1 = arith.constant 0 : i32
    return %c0_i32, %c0_i32_0 : i32, i32
  }
  func.func @transform_5(%arg0: i32) -> (i32, i32) {
    %c0_i32 = arith.constant 0 : i32
    %c0_i32_0 = arith.constant 0 : i32
    %c0_i32_1 = arith.constant 0 : i32
    return %c0_i32, %c0_i32_0 : i32, i32
  }
  func.func @transform_6(%arg0: i32) -> (i32, i32) {
    %c0_i32 = arith.constant 0 : i32
    %c0_i32_0 = arith.constant 0 : i32
    %c0_i32_1 = arith.constant 0 : i32
    return %c0_i32, %c0_i32_0 : i32, i32
  }
  func.func @transform_7(%arg0: i32) -> (i32, i32) {
    %c0_i32 = arith.constant 0 : i32
    %c0_i32_0 = arith.constant 0 : i32
    %c0_i32_1 = arith.constant 0 : i32
    return %c0_i32, %c0_i32_0 : i32, i32
  }
  func.func @transform_8(%arg0: i32) -> (i32, i32) {
    %c0_i32 = arith.constant 0 : i32
    %c0_i32_0 = arith.constant 0 : i32
    return %arg0, %c0_i32 : i32, i32
  }
}

</mosaic_0001>

<bundles_post_ra>
// kernel: tpu_custom_call.1
= control target key start
LH: loop header
LB: loop body
LE: loop exit
PB: predicated region body
PF: predicated region fallthrough
CT: control target
= control target key end

     0   :  { %s1601_s29 = smov 0   ;;  %s1962_s0 = inlined_call_operand.vmem [shape: bf16[256,32], index: 0, kind: input, shape index: {}]   ;;  %s1963_s1 = inlined_call_operand.vmem [shape: f32[256,1], index: 1, kind: input, shape index: {}]   ;;  %s1964_s2 = inlined_call_operand.vmem [shape: bf16[32,384], index: 2, kind: input, shape index: {}]   ;;  %s1965_s3 = inlined_call_operand.vmem [shape: f32[1,384], index: 3, kind: input, shape index: {}]   ;;  %s1966_s4 = inlined_call_operand.vmem [shape: f32[1,384], index: 4, kind: input, shape index: {}]   ;;  %s1967_s5 = inlined_call_operand.vmem [shape: bf16[384,16], index: 5, kind: input, shape index: {}]   ;;  %s1968_s6 = inlined_call_operand.vmem [shape: f32[1,16], index: 6, kind: input, shape index: {}]   ;;  %s1969_s7 = inlined_call_operand.<no memory space> [shape: f32[1,1], index: 7, kind: input, shape index: {}]   ;;  %s1970_s8 = inlined_call_operand.vmem [shape: f32[256,16], index: 8, kind: output, shape index: {}]  }
   0x1   :  { %13 = sst [smem:[#allocation2]] %s1969_s7 }
   0x2 LB: > { %s1244_s30 = sadd.s32 4294967295, %s1550_s29   ;;  %p1248_p0 = scmp.ge.s32.totalorder %s1550_s29, 1  ;;  %s1550_s29 = sphi %s1601_s29, %s19_s29  }
   0x3   : > { %p275_p1 = scmp.lt.s32.totalorder %s1550_s29, 5 }
   0x5   : > { %p276_p2 = pnand %p1248_p0, %p275_p1 }
   0x6   : > { %s1249_s18 = sshll.u32 (!%p276_p2), %s1244_s30, 3  ;;  %s333_s28 = sld [smem:[#allocation2]] (!%p276_p2) }
   0x7   : > { %279 = sbr.rel (%p276_p2) target bundleno = 415 (0x19f), region = 52  ;;  %p315_p3 = scmp.lt.s32.totalorder (!%p276_p2), %s1249_s18, 31 }
   0xc   : > { %v1285_v0 = vld [vmem:[%s1964_s2 + $0x18] sm:$0xf]  ;;  %v1421_v1 = vld [vmem:[%s1964_s2 + $0x20] sm:$0xf0]  ;;  %v1420_v2 = vld [vmem:[%s1964_s2 + $0x1c] sm:$0xf] }
   0xd   : > { %v1286_v3 = vor.u32 %v1421_v1, %v1285_v0  ;;  %v1287_v4 = vld [vmem:[%s1964_s2 + $0x24] sm:$0xf0]  ;;  %v1273_v5 = vld [vmem:[%s1964_s2] sm:$0xf]  ;;  %v1552_v7 = vmov 0   ;;  %s1972_s18 = smov (!%p315_p3, %s1249_s18), 31 }
   0xe   : > { %v1290_v6 = vor.u32 %v1420_v2, %v1287_v4  ;;  %1460 = vset.pattern.permute.xlu0 %v1552_v7  ;;  %v1418_v8 = vld [vmem:[%s1964_s2 + $0x8] sm:$0xf0]  ;;  %v1417_v9 = vld [vmem:[%s1964_s2 + $0x4] sm:$0xf]  ;;  %v1275_v10 = vld [vmem:[%s1964_s2 + $0xc] sm:$0xf0]  ;;  %1461 = vset.pattern.permute.xlu1 %v1552_v7 }
   0xf   : > { %429 = vmatpush.bf16.msra.mxu0 %v1286_v3  ;;  %1447 = vmatpush.bf16.msra.mxu2 %v1286_v3  ;;  %v1274_v11 = vor.u32 %v1418_v8, %v1273_v5  ;;  %v1293_v12 = vld [vmem:[%s1964_s2 + $0x20] sm:$0xf]  ;;  %v1422_v13 = vld [vmem:[%s1964_s2 + $0x28] sm:$0xf0]  ;;  %v1278_v14 = vor.u32 %v1417_v9, %v1275_v10  ;;  %s1252_s30 = sshll.u32 %s1972_s18, 3  ;;  %s1250_s9 = sshll.u32 %s1972_s18, 2 }
  0x10   : > { %458 = vmatpush.bf16.msra.mxu1 %v1290_v6  ;;  %1449 = vmatpush.bf16.msra.mxu3 %v1290_v6  ;;  %v1294_v15 = vor.u32 %v1422_v13, %v1293_v12  ;;  %v1281_v16 = vld [vmem:[%s1964_s2 + $0x8] sm:$0xf]  ;;  %v1419_v17 = vld [vmem:[%s1964_s2 + $0x10] sm:$0xf0]  ;;  %s324_s15 = scalar_lea.vmem %s1963_s1, %s1252_s30  ;;  %s318_s19 = scalar_lea.vmem %s1962_s0, %s1250_s9  ;;  %vm410_vm0 = vcmask 261120   ;;  %v1430_v31 = vld [vmem:[%s1967_s5 + $0x38] sm:$0xff] }
  0x11   : > { %1462 = vset.pattern.permute.xlu2 %v1552_v7  ;;  %v510_v18 = vld [vmem:[%s324_s15] sm:$0xff]  ;;  %v512_v19 = vld [vmem:[%s324_s15 + $0x10] sm:$0xff]  ;;  %v1282_v22 = vor.u32 %v1419_v17, %v1281_v16  ;;  %v511_v24 = vld [vmem:[%s324_s15 + $0x8] sm:$0xff]  ;;  %s614_s14 = ssub.f32 0.0, %s333_s28  ;;  %s1919_s17 = scalar_lea.vmem %s1970_s8, %s1252_s30  ;;  %vm1167_vm5 = vcmask 130048  }
  0x12   : > { %521 = vperm.xlu0 %1460, %v510_v18   ;;  %v1413_v20 = vld [vmem:[%s318_s19] sm:$0xff]  ;;  %v1415_v21 = vld [vmem:[%s318_s19 + $0x10] sm:$0xff]  ;;  %531 = vperm.xlu1 %1461, %v512_v19   ;;  %v513_v25 = vld [vmem:[%s324_s15 + $0x18] sm:$0xff] }
  0x13   : > { %430 = vmatpush.bf16.msra.mxu0 %v1274_v11  ;;  %1448 = vmatpush.bf16.msra.mxu2 %v1274_v11  ;;  %v514_v23 = vld [vmem:[%s324_s15 + $0x20] sm:$0xff]  ;;  %v515_v26 = vld [vmem:[%s324_s15 + $0x28] sm:$0xff]  ;;  %v516_v27 = vld [vmem:[%s324_s15 + $0x30] sm:$0xff]  ;;  %v1737_v56 = vstv %s614_s14 }
  0x14   : > { %459 = vmatpush.bf16.msra.mxu1 %v1278_v14  ;;  %1450 = vmatpush.bf16.msra.mxu3 %v1278_v14  ;;  %v517_v28 = vld [vmem:[%s324_s15 + $0x38] sm:$0xff]  ;;  %v1414_v29 = vld [vmem:[%s318_s19 + $0x8] sm:$0xff]  ;;  %v1429_v33 = vld [vmem:[%s1967_s5 + $0x30] sm:$0xff] }
  0x15   : > { %541 = vperm.xlu2 %1462, %v514_v23   ;;  %v1416_v30 = vld [vmem:[%s318_s19 + $0x18] sm:$0xff]  ;;  %v1437_v34 = vld [vmem:[%s1967_s5 + $0x70] sm:$0xff]  ;;  %v1428_v35 = vld [vmem:[%s1967_s5 + $0x28] sm:$0xff] }
  0x16   : > { %1295 = vmatmul.msk.bf16.vlgmr.msra.gmra.mxu0 %vm410_vm0, %v1413_v20  ;;  %1297 = vmatmul.msk.bf16.vlgmr.msra.gmra.mxu2 %vm410_vm0, %v1415_v21  ;;  %v1438_v32 = vld [vmem:[%s1967_s5 + $0x78] sm:$0xff]  ;;  %v1436_v36 = vld [vmem:[%s1967_s5 + $0x68] sm:$0xff]  ;;  %v1427_v37 = vld [vmem:[%s1967_s5 + $0x20] sm:$0xff] }
  0x17   : > { %487 = vmatpush.bf16.msrb.mxu2 %v1294_v15  ;;  %1299 = vmatmul.msk.bf16.vlgmr.msra.gmra.mxu1 %vm410_vm0, %v1413_v20  ;;  %v1435_v38 = vld [vmem:[%s1967_s5 + $0x60] sm:$0xff]  ;;  %v1426_v39 = vld [vmem:[%s1967_s5 + $0x18] sm:$0xff]  ;;  %v1425_v41 = vld [vmem:[%s1967_s5 + $0x10] sm:$0xff] }
  0x18   : > { %1301 = vmatmul.msk.bf16.vlgmr.msra.gmra.mxu3 %vm410_vm0, %v1415_v21  ;;  %949 = vmatpush.bf16.msrb.mxu0 %v1438_v32  ;;  %v1434_v40 = vld [vmem:[%s1967_s5 + $0x58] sm:$0xff]  ;;  %v1433_v42 = vld [vmem:[%s1967_s5 + $0x50] sm:$0xff]  ;;  %v1424_v43 = vld [vmem:[%s1967_s5 + $0x8] sm:$0xff] }
  0x19   : > { %920 = vmatpush.bf16.msrb.mxu3 %v1430_v31  ;;  %v1432_v44 = vld [vmem:[%s1967_s5 + $0x48] sm:$0xff]  ;;  %v1423_v45 = vld [vmem:[%s1967_s5] sm:$0xff]  ;;  %v1446_v53 = vld [vmem:[%s1967_s5 + $0xb8] sm:$0xff] }
  0x1a   : > { %526 = vperm.xlu0 %1460, %v511_v24   ;;  %536 = vperm.xlu1 %1461, %v513_v25   ;;  %v1431_v46 = vld [vmem:[%s1967_s5 + $0x40] sm:$0xff]  ;;  %v1445_v60 = vld [vmem:[%s1967_s5 + $0xb0] sm:$0xff]  ;;  %v1444_v1 = vld [vmem:[%s1967_s5 + $0xa8] sm:$0xff] }
  0x1b   : > { %488 = vmatpush.bf16.msrb.mxu2 %v1282_v22  ;;  %v1720_v47 = vld [vmem:[%s1966_s4] sm:$0x7]  ;;  %978 = vmatpush.bf16.msrb.mxu1 %v1446_v53 }
  0x1c   : > { %950 = vmatpush.bf16.msrb.mxu0 %v1437_v34  ;;  %v1723_v48 = vperm.slane %v1720_v47, 1  ;;  %v1726_v49 = vperm.slane %v1720_v47, 0  ;;  %v1760_v7 = vld [vmem:[%s1965_s3] sm:$0x7] }
  0x1d   : > { %546 = vperm.xlu2 %1462, %v515_v26   ;;  %921 = vmatpush.bf16.msrb.mxu3 %v1429_v33  ;;  %v1443_v13 = vld [vmem:[%s1967_s5 + $0xa0] sm:$0xff]  ;;  %v1772_v16 = vperm.slane %v1760_v7, 1  ;;  %v1779_v19 = vperm.slane %v1760_v7, 0 }
  0x1f   : > { %979 = vmatpush.bf16.msrb.mxu1 %v1445_v60 }
  0x20   : > { %951 = vmatpush.bf16.msrb.mxu0 %v1436_v36 }
  0x21   : > { %922 = vmatpush.bf16.msrb.mxu3 %v1428_v35 }
  0x22   : > { %551 = vperm.xlu0 %1460, %v516_v27   ;;  %556 = vperm.xlu1 %1461, %v517_v28  }
  0x23   : > { %980 = vmatpush.bf16.msrb.mxu1 %v1444_v1 }
  0x24   : > { %952 = vmatpush.bf16.msrb.mxu0 %v1435_v38 }
  0x25   : > { %923 = vmatpush.bf16.msrb.mxu3 %v1427_v37  ;;  %v1441_v37 = vld [vmem:[%s1967_s5 + $0x90] sm:$0xff] }
  0x26   : > { %1296 = vmatmul.msk.bf16.gmra.mxu0 %vm410_vm0, %v1414_v29  ;;  %1298 = vmatmul.msk.bf16.gmra.mxu2 %vm410_vm0, %v1416_v30 }
  0x27   : > { %1300 = vmatmul.msk.bf16.gmra.mxu1 %vm410_vm0, %v1414_v29 }
  0x28   : > { %1302 = vmatmul.msk.bf16.gmra.mxu3 %vm410_vm0, %v1416_v30  ;;  %953 = vmatpush.bf16.msrb.mxu0 %v1434_v40 }
  0x29   : > { %924 = vmatpush.bf16.msrb.mxu3 %v1426_v39  ;;  %981 = vmatpush.bf16.msrb.mxu1 %v1443_v13 }
  0x2c   : > { %954 = vmatpush.bf16.msrb.mxu0 %v1433_v42 }
  0x2d   : > { %925 = vmatpush.bf16.msrb.mxu3 %v1425_v41 }
  0x30   : > { %955 = vmatpush.bf16.msrb.mxu0 %v1432_v44 }
  0x31   : > { %926 = vmatpush.bf16.msrb.mxu3 %v1424_v43 }
  0x34   : > { %956 = vmatpush.bf16.msrb.mxu0 %v1431_v46 }
  0x35   : > { %927 = vmatpush.bf16.msrb.mxu3 %v1423_v45  ;;  %v1440_v45 = vld [vmem:[%s1967_s5 + $0x88] sm:$0xff] }
  0x36   : > { %1303 = vmatmul.msk.bf16.vlgmr.msrb.gmra.mxu2 %vm410_vm0, %v1413_v20 }
  0x46   : > { %1304 = vmatmul.msk.bf16.gmra.mxu2 %vm410_vm0, %v1414_v29 }
  0x56   : > { %1305 = vmatmul.msk.bf16.gmra.mxu2 %vm410_vm0, %v1415_v21  ;;  %v1442_v21 = vld [vmem:[%s1967_s5 + $0x98] sm:$0xff] }
  0x57   : > { %982 = vmatpush.bf16.msrb.mxu1 %v1442_v21 }
  0x5b   : > { %983 = vmatpush.bf16.msrb.mxu1 %v1441_v37 }
  0x5f   : > { %984 = vmatpush.bf16.msrb.mxu1 %v1440_v45 }
  0x66   : > { %1306 = vmatmul.msk.bf16.gmra.mxu2 %vm410_vm0, %v1416_v30 }
  0x6f   : > { %v1776_v18 = vpop.permute.xlu2 %541 }
  0x84   : > { %v1728_v50 = vpop.permute.xlu0 %521  ;;  %v1739_v57 = vpop.permute.xlu1 %531 }
  0x85   : > { %v566_v51 = vsub.f32 %v1728_v50, %v1726_v49  ;;  %v567_v52 = vsub.f32 %v1728_v50, %v1723_v48  ;;  %v572_v9 = vsub.f32 %v1739_v57, %v1726_v49  ;;  %v573_v11 = vsub.f32 %v1739_v57, %v1723_v48 }
  0x87   : > { %v590_v54 = vmul.f32 %v566_v51, %v566_v51  ;;  %v591_v55 = vmul.f32 %v567_v52, %v567_v52  ;;  %v596_v22 = vmul.f32 %v572_v9, %v572_v9  ;;  %v597_v24 = vmul.f32 %v573_v11, %v573_v11  ;;  %v1802_v52 = vpop.permute.xlu2 %546 }
  0x88   : > { %v1818_v9 = vperm.slane %v1720_v47, 2 }
  0x89   : > { %v616_v58 = vmul.f32 %v1737_v56, %v590_v54  ;;  %v617_v59 = vmul.f32 %v1737_v56, %v591_v55  ;;  %v622_v31 = vmul.f32 %v1737_v56, %v596_v22  ;;  %v623_v34 = vmul.f32 %v1737_v56, %v597_v24 }
  0x8a   : > { %v579_v55 = vsub.f32 %v1776_v18, %v1723_v48 }
  0x8b   : > { %v640_v62 = vmul.f32 1.442695, %v616_v58  ;;  %v642_v2 = vmul.f32 1.442695, %v617_v59  ;;  %v652_v46 = vmul.f32 1.442695, %v622_v31 }
  0x8c   : > { %v1746_v61 = vpop.permute.xlu0 %526  ;;  %v1766_v12 = vpop.permute.xlu1 %536  ;;  %v654_v53 = vmul.f32 1.442695, %v623_v34 }
  0x8d   : > { %v569_v63 = vsub.f32 %v1746_v61, %v1726_v49  ;;  %v570_v0 = vsub.f32 %v1746_v61, %v1723_v48  ;;  %1464 = vpow2.f32 %v640_v62  ;;  %v575_v17 = vsub.f32 %v1766_v12, %v1726_v49 }
  0x8e   : > { %1466 = vpow2.f32 %v642_v2  ;;  %v576_v20 = vsub.f32 %v1766_v12, %v1723_v48  ;;  %v582_v62 = vsub.f32 %v1802_v52, %v1723_v48  ;;  %v578_v2 = vsub.f32 %v1776_v18, %v1726_v49 }
  0x8f   : > { %v593_v3 = vmul.f32 %v569_v63, %v569_v63  ;;  %v594_v4 = vmul.f32 %v570_v0, %v570_v0  ;;  %v599_v28 = vmul.f32 %v575_v17, %v575_v17  ;;  %v581_v0 = vsub.f32 %v1802_v52, %v1726_v49 }
  0x90   : > { %v600_v30 = vmul.f32 %v576_v20, %v576_v20 }
  0x91   : > { %v619_v5 = vmul.f32 %v1737_v56, %v593_v3  ;;  %v620_v6 = vmul.f32 %v1737_v56, %v594_v4  ;;  %v625_v41 = vmul.f32 %v1737_v56, %v599_v28  ;;  %v1439_v4 = vld [vmem:[%s1967_s5 + $0x80] sm:$0xff] }
  0x92   : > { %v626_v44 = vmul.f32 %v1737_v56, %v600_v30  ;;  %985 = vmatpush.bf16.msrb.mxu1 %v1439_v4 }
  0x93   : > { %v432_v8 = vpop.f32.mrf.mxu0  ;;  %v646_v14 = vmul.f32 1.442695, %v619_v5  ;;  %v648_v15 = vmul.f32 1.442695, %v620_v6  ;;  %v1465_v25 = vpop.eup %1464  ;;  %v658_v58 = vmul.f32 1.442695, %v625_v41  ;;  %v603_v5 = vmul.f32 %v579_v55, %v579_v55 }
  0x94   : > { %v461_v10 = vpop.f32.mrf.mxu1  ;;  %v433_v23 = vadd.f32 %v432_v8, %v1779_v19  ;;  %v1467_v29 = vpop.eup %1466  ;;  %v660_v63 = vmul.f32 1.442695, %v626_v44  ;;  %v606_v6 = vmul.f32 %v582_v62, %v582_v62  ;;  %v605_v8 = vmul.f32 %v581_v0, %v581_v0 }
  0x95   : > { %1468 = vpow2.f32 %v646_v14  ;;  %v462_v26 = vadd.f32 %v461_v10, %v1772_v16  ;;  %v602_v10 = vmul.f32 %v578_v2, %v578_v2  ;;  %v1834_v41 = vpop.permute.xlu1 %556 }
  0x96   : > { %1470 = vpow2.f32 %v648_v15  ;;  %v688_v33 = vmul.f32 %v1465_v25, %v433_v23  ;;  %v629_v15 = vmul.f32 %v1737_v56, %v603_v5  ;;  %v632_v22 = vmul.f32 %v1737_v56, %v606_v6 }
  0x97   : > { %v689_v39 = vmul.f32 %v1467_v29, %v462_v26  ;;  %1472 = vpow2.f32 %v652_v46  ;;  %v631_v24 = vmul.f32 %v1737_v56, %v605_v8  ;;  %v568_v26 = vsub.f32 %v1728_v50, %v1818_v9  ;;  %v1838_v46 = vpop.permute.xlu0 %551 }
  0x98   : > { %1474 = vpow2.f32 %v654_v53  ;;  %v628_v28 = vmul.f32 %v1737_v56, %v602_v10 }
  0x99   : > { %v1788_v27 = vpop.f32.mrf.mxu2  ;;  %1476 = vpow2.f32 %v658_v58  ;;  %v584_v58 = vsub.f32 %v1838_v46, %v1726_v49 }
  0x9a   : > { %1478 = vpow2.f32 %v660_v63 }
  0x9b   : > { %v434_v32 = vpop.f32.mrf.mxu0  ;;  %v1469_v38 = vpop.eup %1468  ;;  %v608_v10 = vmul.f32 %v584_v58, %v584_v58 }
  0x9c   : > { %v435_v35 = vadd.f32 %v434_v32, %v1779_v19  ;;  %v463_v36 = vpop.f32.mrf.mxu1  ;;  %v1471_v42 = vpop.eup %1470  ;;  %v666_v32 = vmul.f32 1.442695, %v629_v15 }
  0x9d   : > { %v464_v40 = vadd.f32 %v463_v36, %v1772_v16  ;;  %v471_v11 = vpop.f32.mrf.mxu3  ;;  %v1473_v14 = vpop.eup %1472  ;;  %v672_v36 = vmul.f32 1.442695, %v632_v22 }
  0x9e   : > { %v691_v43 = vmul.f32 %v1469_v38, %v435_v35  ;;  %v1475_v21 = vpop.eup %1474  ;;  %v670_v38 = vmul.f32 1.442695, %v631_v24  ;;  %1480 = vpow2.f32 %v666_v32  ;;  %v472_v63 = vadd.f32 %v471_v11, %v1772_v16 }
  0x9f   : > { %v692_v51 = vmul.f32 %v1471_v42, %v464_v40  ;;  %v1477_v23 = vpop.eup %1476  ;;  %v592_v40 = vmul.f32 %v568_v26, %v568_v26  ;;  %v664_v42 = vmul.f32 1.442695, %v628_v28  ;;  %1482 = vpow2.f32 %v672_v36 }
  0xa0   : > { %v712_v54 = vpack.c.bf16 %v691_v43, %v688_v33  ;;  %v1479_v47 = vpop.eup %1478  ;;  %v571_v33 = vsub.f32 %v1746_v61, %v1818_v9  ;;  %1484 = vpow2.f32 %v670_v38  ;;  %v574_v11 = vsub.f32 %v1739_v57, %v1818_v9 }
  0xa1   : > { %v1806_v59 = vpop.f32.mrf.mxu2  ;;  %v713_v60 = vpack.c.bf16 %v692_v51, %v689_v39  ;;  %v587_v51 = vsub.f32 %v1834_v41, %v1726_v49  ;;  %v618_v53 = vmul.f32 %v1737_v56, %v592_v40  ;;  %1486 = vpow2.f32 %v664_v42 }
  0xa2   : > { %928 = vmatmul.bf16.vlgmr.msrb.gmra.mxu3 %v712_v54  ;;  %v595_v43 = vmul.f32 %v571_v33, %v571_v33  ;;  %v588_v54 = vsub.f32 %v1834_v41, %v1723_v48  ;;  %v445_v4 = vadd.f32 %v1806_v59, %v1779_v19  ;;  %v443_v49 = vadd.f32 %v1788_v27, %v1779_v19 }
  0xa3   : > { %957 = vmatmul.bf16.vlgmr.msrb.gmra.mxu0 %v713_v60  ;;  %v437_v1 = vpop.f32.mrf.mxu0  ;;  %v585_v60 = vsub.f32 %v1838_v46, %v1723_v48  ;;  %v1861_v24 = vperm.slane %v1760_v7, 2  ;;  %v577_v27 = vsub.f32 %v1766_v12, %v1818_v9 }
  0xa4   : > { %v466_v3 = vpop.f32.mrf.mxu1  ;;  %v438_v13 = vadd.f32 %v437_v1, %v1779_v19  ;;  %v621_v55 = vmul.f32 %v1737_v56, %v595_v43  ;;  %v1481_v62 = vpop.eup %1480  ;;  %v611_v1 = vmul.f32 %v587_v51, %v587_v51  ;;  %v612_v5 = vmul.f32 %v588_v54, %v588_v54 }
  0xa5   : > { %v467_v17 = vadd.f32 %v466_v3, %v1772_v16  ;;  %v473_v61 = vpop.f32.mrf.mxu3  ;;  %v1483_v2 = vpop.eup %1482  ;;  %v644_v3 = vmul.f32 1.442695, %v618_v53  ;;  %v609_v48 = vmul.f32 %v585_v60, %v585_v60  ;;  %v701_v15 = vmul.f32 %v1481_v62, %v472_v63 }
  0xa6   : > { %v694_v29 = vmul.f32 %v1473_v14, %v438_v13  ;;  %v474_v0 = vadd.f32 %v473_v61, %v1772_v16  ;;  %v1485_v6 = vpop.eup %1484  ;;  %v650_v8 = vmul.f32 1.442695, %v621_v55  ;;  %v638_v59 = vmul.f32 %v1737_v56, %v612_v5 }
  0xa7   : > { %v695_v34 = vmul.f32 %v1475_v21, %v467_v17  ;;  %v1487_v14 = vpop.eup %1486  ;;  %v637_v21 = vmul.f32 %v1737_v56, %v611_v1  ;;  %1488 = vpow2.f32 %v644_v3  ;;  %v703_v22 = vmul.f32 %v1485_v6, %v445_v4 }
  0xa8   : > { %v704_v17 = vmul.f32 %v1483_v2, %v474_v0  ;;  %1490 = vpow2.f32 %v650_v8  ;;  %v635_v57 = vmul.f32 %v1737_v56, %v609_v48  ;;  %v601_v33 = vmul.f32 %v577_v27, %v577_v27 }
  0xa9   : > { %v1823_v20 = vpop.f32.mrf.mxu2  ;;  %v682_v26 = vmul.f32 1.442695, %v637_v21  ;;  %v580_v1 = vsub.f32 %v1776_v18, %v1818_v9 }
  0xaa   : > { %v719_v28 = vpack.c.bf16 %v704_v17, %v701_v15  ;;  %v678_v36 = vmul.f32 1.442695, %v635_v57  ;;  %v448_v60 = vadd.f32 %v1823_v20, %v1779_v19 }
  0xab   : > { %v439_v25 = vpop.f32.mrf.mxu0  ;;  %1492 = vpow2.f32 %v682_v26  ;;  %v604_v6 = vmul.f32 %v580_v1, %v580_v1 }
  0xac   : > { %v440_v30 = vadd.f32 %v439_v25, %v1779_v19  ;;  %v468_v31 = vpop.f32.mrf.mxu1  ;;  %v634_v25 = vmul.f32 %v1737_v56, %v608_v10 }
  0xad   : > { %v469_v35 = vadd.f32 %v468_v31, %v1772_v16  ;;  %v630_v48 = vmul.f32 %v1737_v56, %v604_v6 }
  0xae   : > { %v697_v37 = vmul.f32 %v1477_v23, %v440_v30  ;;  %v476_v23 = vpop.f32.mrf.mxu3  ;;  %v684_v30 = vmul.f32 1.442695, %v638_v59  ;;  %v586_v59 = vsub.f32 %v1838_v46, %v1818_v9 }
  0xaf   : > { %v698_v39 = vmul.f32 %v1479_v47, %v469_v35  ;;  %v700_v47 = vmul.f32 %v1487_v14, %v443_v49  ;;  %v1489_v35 = vpop.eup %1488  ;;  %v477_v63 = vadd.f32 %v476_v23, %v1772_v16  ;;  %v668_v17 = vmul.f32 1.442695, %v630_v48 }
  0xb0   : > { %v715_v50 = vpack.c.bf16 %v697_v37, %v694_v29  ;;  %v598_v29 = vmul.f32 %v574_v11, %v574_v11  ;;  %v1491_v12 = vpop.eup %1490  ;;  %1494 = vpow2.f32 %v684_v30  ;;  %v589_v23 = vsub.f32 %v1834_v41, %v1818_v9 }
  0xb1   : > { %v1836_v44 = vpop.f32.mrf.mxu2  ;;  %v716_v45 = vpack.c.bf16 %v698_v39, %v695_v34  ;;  %v718_v32 = vpack.c.bf16 %v703_v22, %v700_v47  ;;  %v676_v34 = vmul.f32 1.442695, %v634_v25  ;;  %v1493_v51 = vpop.eup %1492  ;;  %v610_v27 = vmul.f32 %v586_v59, %v586_v59 }
  0xb2   : > { %933 = vmatmul.bf16.gmra.mxu3 %v715_v50  ;;  %v624_v38 = vmul.f32 %v1737_v56, %v598_v29  ;;  %v627_v50 = vmul.f32 %v1737_v56, %v601_v33  ;;  %v450_v61 = vadd.f32 %v1836_v44, %v1779_v19  ;;  %v583_v44 = vsub.f32 %v1802_v52, %v1818_v9 }
  0xb3   : > { %962 = vmatmul.bf16.gmra.mxu0 %v716_v45  ;;  %1496 = vpow2.f32 %v676_v34  ;;  %v613_v47 = vmul.f32 %v589_v23, %v589_v23  ;;  %v636_v30 = vmul.f32 %v1737_v56, %v610_v27 }
  0xb4   : > { %1498 = vpow2.f32 %v678_v36  ;;  %v656_v45 = vmul.f32 1.442695, %v624_v38  ;;  %v662_v53 = vmul.f32 1.442695, %v627_v50  ;;  %v709_v2 = vmul.f32 %v1493_v51, %v450_v61 }
  0xb5   : > { %v607_v20 = vmul.f32 %v583_v44, %v583_v44  ;;  %v639_v33 = vmul.f32 %v1737_v56, %v613_v47  ;;  %v680_v34 = vmul.f32 1.442695, %v636_v30 }
  0xb6   : > { %v478_v42 = vpop.f32.mrf.mxu3  ;;  %v1495_v58 = vpop.eup %1494  ;;  %1500 = vpow2.f32 %v656_v45 }
  0xb7   : > { %v479_v54 = vadd.f32 %v478_v42, %v1772_v16  ;;  %1502 = vpow2.f32 %v662_v53  ;;  %v633_v11 = vmul.f32 %v1737_v56, %v607_v20 }
  0xb8   : > { %1504 = vpow2.f32 %v668_v17 }
  0xb9   : > { %v490_v13 = vpop.f32.mrf.mxu2  ;;  %v1497_v62 = vpop.eup %1496  ;;  %v710_v3 = vmul.f32 %v1495_v58, %v479_v54  ;;  %v674_v21 = vmul.f32 1.442695, %v633_v11 }
  0xba   : > { %v491_v31 = vadd.f32 %v490_v13, %v1861_v24  ;;  %v1499_v0 = vpop.eup %1498  ;;  %v706_v4 = vmul.f32 %v1497_v62, %v448_v60 }
  0xbb   : > { %v707_v5 = vmul.f32 %v1499_v0, %v477_v63  ;;  %1506 = vpow2.f32 %v674_v21 }
  0xbc   : > { %v690_v39 = vmul.f32 %v1489_v35, %v491_v31  ;;  %v721_v19 = vpack.c.bf16 %v709_v2, %v706_v4  ;;  %v1501_v13 = vpop.eup %1500  ;;  %1508 = vpow2.f32 %v680_v34 }
  0xbd   : > { %v722_v16 = vpack.c.bf16 %v710_v3, %v707_v5  ;;  %v1503_v18 = vpop.eup %1502 }
  0xbe   : > { %v1505_v26 = vpop.eup %1504 }
  0xc1   : > { %v492_v7 = vpop.f32.mrf.mxu2  ;;  %v1507_v29 = vpop.eup %1506 }
  0xc2   : > { %v493_v37 = vadd.f32 %v492_v7, %v1861_v24  ;;  %938 = vmatmul.bf16.gmra.mxu3 %v718_v32  ;;  %v686_v7 = vmul.f32 1.442695, %v639_v33  ;;  %v1509_v36 = vpop.eup %1508 }
  0xc3   : > { %967 = vmatmul.bf16.gmra.mxu0 %v719_v28 }
  0xc4   : > { %v693_v40 = vmul.f32 %v1491_v12, %v493_v37  ;;  %1510 = vpow2.f32 %v686_v7 }
  0xc6   : > { %v714_v43 = vpack.c.bf16 %v693_v40, %v690_v39 }
  0xc8   : > { %986 = vmatmul.bf16.vlgmr.msrb.gmra.mxu1 %v714_v43  ;;  %v1898_v43 = vld [vmem:[%s1968_s6] ss:$0 sm:$0xff] }
  0xc9   : > { %v495_v55 = vpop.f32.mrf.mxu2 }
  0xca   : > { %v496_v8 = vadd.f32 %v495_v55, %v1861_v24  ;;  %v1511_v12 = vpop.eup %1510 }
  0xcc   : > { %v696_v52 = vmul.f32 %v1501_v13, %v496_v8 }
  0xd1   : > { %v497_v10 = vpop.f32.mrf.mxu2 }
  0xd2   : > { %v498_v49 = vadd.f32 %v497_v10, %v1861_v24  ;;  %943 = vmatmul.bf16.gmra.mxu3 %v721_v19 }
  0xd3   : > { %972 = vmatmul.bf16.gmra.mxu0 %v722_v16 }
  0xd4   : > { %v699_v14 = vmul.f32 %v1503_v18, %v498_v49 }
  0xd6   : > { %v717_v15 = vpack.c.bf16 %v699_v14, %v696_v52 }
  0xd8   : > { %991 = vmatmul.bf16.gmra.mxu1 %v717_v15 }
  0xd9   : > { %v500_v22 = vpop.f32.mrf.mxu2 }
  0xda   : > { %v501_v25 = vadd.f32 %v500_v22, %v1861_v24 }
  0xdc   : > { %v702_v31 = vmul.f32 %v1505_v26, %v501_v25 }
  0xe1   : > { %v502_v57 = vpop.f32.mrf.mxu2 }
  0xe2   : > { %v503_v28 = vadd.f32 %v502_v57, %v1861_v24 }
  0xe4   : > { %v705_v32 = vmul.f32 %v1507_v29, %v503_v28 }
  0xe6   : > { %v720_v46 = vpack.c.bf16 %v705_v32, %v702_v31 }
  0xe8   : > { %996 = vmatmul.bf16.gmra.mxu1 %v720_v46 }
  0xe9   : > { %v505_v9 = vpop.f32.mrf.mxu2 }
  0xea   : > { %v506_v41 = vadd.f32 %v505_v9, %v1861_v24 }
  0xec   : > { %v708_v38 = vmul.f32 %v1509_v36, %v506_v41 }
  0xf1   : > { %v507_v35 = vpop.f32.mrf.mxu2 }
  0xf2   : > { %v508_v37 = vadd.f32 %v507_v35, %v1861_v24 }
  0xf4   : > { %v711_v39 = vmul.f32 %v1511_v12, %v508_v37 }
  0xf6   : > { %v723_v40 = vpack.c.bf16 %v711_v39, %v708_v38 }
  0xf8   : > { %1001 = vmatmul.bf16.gmra.mxu1 %v723_v40 }
 0x120   : > { %v958_v56 = vpop.f32.mrf.mxu0 }
 0x125   : > { %v929_v50 = vpop.f32.mrf.mxu3 }
 0x126   : > { %v930_v61 = vadd.f32 %v1898_v43, %v929_v50 }
 0x128   : > { %v960_v45 = vpop.f32.mrf.mxu0  ;;  %v959_v53 = vadd.f32 %v958_v56, %v930_v61 }
 0x12d   : > { %v931_v42 = vpop.f32.mrf.mxu3 }
 0x12e   : > { %v932_v55 = vadd.f32 %v1898_v43, %v931_v42 }
 0x130   : > { %v963_v60 = vpop.f32.mrf.mxu0  ;;  %v961_v62 = vadd.f32 %v960_v45, %v932_v55 }
 0x135   : > { %v934_v51 = vpop.f32.mrf.mxu3 }
 0x136   : > { %v935_v44 = vadd.f32 %v1898_v43, %v934_v51 }
 0x138   : > { %v965_v5 = vpop.f32.mrf.mxu0  ;;  %v964_v6 = vadd.f32 %v963_v60, %v935_v44 }
 0x13d   : > { %v936_v63 = vpop.f32.mrf.mxu3 }
 0x13e   : > { %v937_v16 = vadd.f32 %v1898_v43, %v936_v63 }
 0x140   : > { %v966_v14 = vadd.f32 %v965_v5, %v937_v16  ;;  %v968_v11 = vpop.f32.mrf.mxu0 }
 0x145   : > { %v987_v54 = vpop.f32.mrf.mxu1  ;;  %v939_v20 = vpop.f32.mrf.mxu3 }
 0x146   : > { %v988_v24 = vadd.f32 %v987_v54, %v959_v53  ;;  %v940_v27 = vadd.f32 %v1898_v43, %v939_v20 }
 0x148   : > { %v1403_v58 = vmul.f32 -1.442695, %v988_v24  ;;  %v969_v34 = vadd.f32 %v968_v11, %v940_v27  ;;  %v970_v37 = vpop.f32.mrf.mxu0 }
 0x14a   : > { %1512 = vpow2.f32 %v1403_v58 }
 0x14d   : > { %v989_v0 = vpop.f32.mrf.mxu1  ;;  %v941_v28 = vpop.f32.mrf.mxu3 }
 0x14e   : > { %v1902_v1 = vadd.f32 %v989_v0, %v961_v62  ;;  %v942_v38 = vadd.f32 %v1898_v43, %v941_v28 }
 0x150   : > { %v1513_v2 = vpop.eup %1512  ;;  %v1404_v3 = vmul.f32 -1.442695, %v1902_v1  ;;  %v971_v55 = vadd.f32 %v970_v37, %v942_v38 }
 0x151   : > { %v1031_v4 = vadd.f32 1.0, %v1513_v2 }
 0x152   : > { %1514 = vpow2.f32 %v1404_v3 }
 0x153   : > { %1516 = vrcp.f32 %v1031_v4  ;;  %v1050_v15 = vand.u32 2147483648, %v1031_v4  ;;  %v1048_v22 = vand.u32 2147483647, %v1031_v4  ;;  %vm1044_vm2 = vweird.f32 %v1031_v4 }
 0x155   : > { %v992_v8 = vpop.f32.mrf.mxu1  ;;  %v1051_v26 = vor.u32 1.1754944e-38, %v1050_v15  ;;  %vm1049_vm4 = vcmp.eq.f32.partialorder %v1048_v22, 8.507059e+37  ;;  %v944_v53 = vpop.f32.mrf.mxu3 }
 0x156   : > { %v1906_v19 = vadd.f32 %v992_v8, %v964_v6  ;;  %v945_v44 = vadd.f32 %v1898_v43, %v944_v53 }
 0x158   : > { %v1515_v10 = vpop.eup %1514  ;;  %v1405_v13 = vmul.f32 -1.442695, %v1906_v19 }
 0x159   : > { %v1517_v49 = vpop.eup %1516  ;;  %v1032_v18 = vadd.f32 1.0, %v1515_v10 }
 0x15a   : > { %v1040_v48 = vmul.f32 %v1517_v49, %v1031_v4  ;;  %1518 = vpow2.f32 %v1405_v13  ;;  %vm1045_vm1 = vweird.f32 %v1517_v49 }
 0x15b   : > { %1520 = vrcp.f32 %v1032_v18  ;;  %vm1046_vm3 = vmor %vm1044_vm2, %vm1045_vm1  ;;  %v1065_v7 = vand.u32 2147483648, %v1032_v18  ;;  %v1063_v35 = vand.u32 2147483647, %v1032_v18  ;;  %vm1059_vm7 = vweird.f32 %v1032_v18 }
 0x15c   : > { %v1041_v52 = vsub.f32 1.0, %v1040_v48 }
 0x15d   : > { %v994_v17 = vpop.f32.mrf.mxu1  ;;  %v1066_v56 = vor.u32 1.1754944e-38, %v1065_v7  ;;  %vm1064_vm9 = vcmp.eq.f32.partialorder %v1063_v35, 8.507059e+37  ;;  %v946_v48 = vpop.f32.mrf.mxu3 }
 0x15e   : > { %v1042_v21 = vmul.f32 %v1517_v49, %v1041_v52  ;;  %v1910_v59 = vadd.f32 %v994_v17, %v966_v14  ;;  %v947_v22 = vadd.f32 %v1898_v43, %v946_v48 }
 0x160   : > { %v1519_v23 = vpop.eup %1518  ;;  %v1043_v25 = vadd.f32 %v1517_v49, %v1042_v21  ;;  %v1406_v47 = vmul.f32 -1.442695, %v1910_v59 }
 0x161   : > { %v1521_v57 = vpop.eup %1520  ;;  %v1033_v29 = vadd.f32 1.0, %v1519_v23 }
 0x162   : > { %v1047_v30 = vsel %vm1046_vm3, %v1517_v49, %v1043_v25  ;;  %v1055_v31 = vmul.f32 %v1521_v57, %v1032_v18  ;;  %1522 = vpow2.f32 %v1406_v47  ;;  %vm1060_vm6 = vweird.f32 %v1521_v57 }
 0x163   : > { %v1052_v32 = vsel %vm1049_vm4, %v1051_v26, %v1047_v30  ;;  %1524 = vrcp.f32 %v1033_v29  ;;  %vm1061_vm8 = vmor %vm1059_vm7, %vm1060_vm6  ;;  %v1080_v58 = vand.u32 2147483648, %v1033_v29  ;;  %v1078_v63 = vand.u32 2147483647, %v1033_v29 }
 0x164   : > { %v1159_v33 = vmul.f32 %v1052_v32, %v988_v24  ;;  %v1056_v46 = vsub.f32 1.0, %v1055_v31  ;;  %vm1074_vm11 = vweird.f32 %v1033_v29 }
 0x165   : > { %v997_v9 = vpop.f32.mrf.mxu1  ;;  %v1081_v6 = vor.u32 1.1754944e-38, %v1080_v58  ;;  %vm1079_vm13 = vcmp.eq.f32.partialorder %v1078_v63, 8.507059e+37 }
 0x166   : > { %1168 = vst.msk [vmem:[%s1919_s17] sm:$0xff] %vm1167_vm5, %v1159_v33  ;;  %v1057_v41 = vmul.f32 %v1521_v57, %v1056_v46  ;;  %v1923_v36 = vadd.f32 %v997_v9, %v969_v34 }
 0x168   : > { %v1523_v12 = vpop.eup %1522  ;;  %v1058_v39 = vadd.f32 %v1521_v57, %v1057_v41  ;;  %v1407_v40 = vmul.f32 -1.442695, %v1923_v36 }
 0x169   : > { %v1525_v50 = vpop.eup %1524  ;;  %v1034_v42 = vadd.f32 1.0, %v1523_v12 }
 0x16a   : > { %v1062_v45 = vsel %vm1061_vm8, %v1521_v57, %v1058_v39  ;;  %v1070_v61 = vmul.f32 %v1525_v50, %v1033_v29  ;;  %1526 = vpow2.f32 %v1407_v40  ;;  %vm1075_vm10 = vweird.f32 %v1525_v50 }
 0x16b   : > { %v1067_v51 = vsel %vm1064_vm9, %v1066_v56, %v1062_v45  ;;  %1528 = vrcp.f32 %v1034_v42  ;;  %vm1076_vm12 = vmor %vm1074_vm11, %vm1075_vm10  ;;  %v1095_v52 = vand.u32 2147483648, %v1034_v42  ;;  %v1093_v15 = vand.u32 2147483647, %v1034_v42 }
 0x16c   : > { %v1160_v54 = vmul.f32 %v1067_v51, %v1902_v1  ;;  %v1071_v24 = vsub.f32 1.0, %v1070_v61  ;;  %v973_v1 = vpop.f32.mrf.mxu0  ;;  %vm1089_vm15 = vweird.f32 %v1034_v42 }
 0x16d   : > { %v999_v60 = vpop.f32.mrf.mxu1  ;;  %v974_v18 = vadd.f32 %v973_v1, %v945_v44  ;;  %v1096_v25 = vor.u32 1.1754944e-38, %v1095_v52  ;;  %vm1094_vm1 = vcmp.eq.f32.partialorder %v1093_v15, 8.507059e+37 }
 0x16e   : > { %1169 = vst.msk [vmem:[%s1919_s17 + $0x8] sm:$0xff] %vm1167_vm5, %v1160_v54  ;;  %v1072_v62 = vmul.f32 %v1525_v50, %v1071_v24  ;;  %v1930_v0 = vadd.f32 %v999_v60, %v971_v55 }
 0x170   : > { %v1527_v2 = vpop.eup %1526  ;;  %v1073_v3 = vadd.f32 %v1525_v50, %v1072_v62  ;;  %v1408_v4 = vmul.f32 -1.442695, %v1930_v0 }
 0x171   : > { %v1529_v5 = vpop.eup %1528  ;;  %v1035_v8 = vadd.f32 1.0, %v1527_v2 }
 0x172   : > { %v1077_v20 = vsel %vm1076_vm12, %v1525_v50, %v1073_v3  ;;  %v1085_v10 = vmul.f32 %v1529_v5, %v1034_v42  ;;  %1530 = vpow2.f32 %v1408_v4  ;;  %vm1090_vm14 = vweird.f32 %v1529_v5 }
 0x173   : > { %v1082_v16 = vsel %vm1079_vm13, %v1081_v6, %v1077_v20  ;;  %1532 = vrcp.f32 %v1035_v8  ;;  %vm1091_vm0 = vmor %vm1089_vm15, %vm1090_vm14  ;;  %v1110_v32 = vand.u32 2147483648, %v1035_v8  ;;  %v1108_v34 = vand.u32 2147483647, %v1035_v8 }
 0x174   : > { %v1161_v13 = vmul.f32 %v1082_v16, %v1906_v19  ;;  %v1086_v49 = vsub.f32 1.0, %v1085_v10  ;;  %v975_v28 = vpop.f32.mrf.mxu0  ;;  %vm1104_vm3 = vweird.f32 %v1035_v8 }
 0x175   : > { %v1002_v14 = vpop.f32.mrf.mxu1  ;;  %v976_v43 = vadd.f32 %v975_v28, %v947_v22  ;;  %vm1109_vm6 = vcmp.eq.f32.partialorder %v1108_v34, 8.507059e+37 }
 0x176   : > { %1170 = vst.msk [vmem:[%s1919_s17 + $0x10] sm:$0xff] %vm1167_vm5, %v1161_v13  ;;  %v1087_v11 = vmul.f32 %v1529_v5, %v1086_v49  ;;  %v1937_v17 = vadd.f32 %v1002_v14, %v974_v18 }
 0x178   : > { %v1531_v21 = vpop.eup %1530  ;;  %v1088_v23 = vadd.f32 %v1529_v5, %v1087_v11  ;;  %v1409_v27 = vmul.f32 -1.442695, %v1937_v17 }
 0x179   : > { %v1533_v19 = vpop.eup %1532  ;;  %v1036_v47 = vadd.f32 1.0, %v1531_v21 }
 0x17a   : > { %v1092_v57 = vsel %vm1091_vm0, %v1529_v5, %v1088_v23  ;;  %v1100_v26 = vmul.f32 %v1533_v19, %v1035_v8  ;;  %1534 = vpow2.f32 %v1409_v27  ;;  %vm1105_vm2 = vweird.f32 %v1533_v19 }
 0x17b   : > { %v1097_v29 = vsel %vm1094_vm1, %v1096_v25, %v1092_v57  ;;  %1536 = vrcp.f32 %v1036_v47  ;;  %vm1106_vm4 = vmor %vm1104_vm3, %vm1105_vm2  ;;  %v1125_v42 = vand.u32 2147483648, %v1036_v47  ;;  %v1123_v61 = vand.u32 2147483647, %v1036_v47 }
 0x17c   : > { %v1162_v30 = vmul.f32 %v1097_v29, %v1910_v59  ;;  %v1101_v31 = vsub.f32 1.0, %v1100_v26  ;;  %v1111_v59 = vor.u32 1.1754944e-38, %v1110_v32  ;;  %vm1119_vm8 = vweird.f32 %v1036_v47 }
 0x17d   : > { %v1004_v33 = vpop.f32.mrf.mxu1  ;;  %v1126_v24 = vor.u32 1.1754944e-38, %v1125_v42  ;;  %vm1124_vm10 = vcmp.eq.f32.partialorder %v1123_v61, 8.507059e+37 }
 0x17e   : > { %1171 = vst.msk [vmem:[%s1919_s17 + $0x18] sm:$0xff] %vm1167_vm5, %v1162_v30  ;;  %v1102_v46 = vmul.f32 %v1533_v19, %v1101_v31  ;;  %v1944_v7 = vadd.f32 %v1004_v33, %v976_v43 }
 0x180   : > { %v1535_v9 = vpop.eup %1534  ;;  %v1103_v41 = vadd.f32 %v1533_v19, %v1102_v46  ;;  %v1410_v35 = vmul.f32 -1.442695, %v1944_v7 }
 0x181   : > { %v1537_v37 = vpop.eup %1536  ;;  %v1037_v12 = vadd.f32 1.0, %v1535_v9 }
 0x182   : > { %v1107_v38 = vsel %vm1106_vm4, %v1533_v19, %v1103_v41  ;;  %v1115_v39 = vmul.f32 %v1537_v37, %v1036_v47  ;;  %1538 = vpow2.f32 %v1410_v35  ;;  %vm1120_vm7 = vweird.f32 %v1537_v37 }
 0x183   : > { %v1112_v40 = vsel %vm1109_vm6, %v1111_v59, %v1107_v38  ;;  %1540 = vrcp.f32 %v1037_v12  ;;  %vm1121_vm9 = vmor %vm1119_vm8, %vm1120_vm7  ;;  %v1140_v2 = vand.u32 2147483648, %v1037_v12  ;;  %v1138_v3 = vand.u32 2147483647, %v1037_v12 }
 0x184   : > { %v1163_v50 = vmul.f32 %v1112_v40, %v1923_v36  ;;  %v1116_v56 = vsub.f32 1.0, %v1115_v39  ;;  %vm1134_vm12 = vweird.f32 %v1037_v12 }
 0x185   : > { %v1141_v1 = vor.u32 1.1754944e-38, %v1140_v2  ;;  %vm1139_vm14 = vcmp.eq.f32.partialorder %v1138_v3, 8.507059e+37 }
 0x186   : > { %1172 = vst.msk [vmem:[%s1919_s17 + $0x20] sm:$0xff] %vm1167_vm5, %v1163_v50  ;;  %v1117_v45 = vmul.f32 %v1537_v37, %v1116_v56 }
 0x188   : > { %v1539_v51 = vpop.eup %1538  ;;  %v1118_v53 = vadd.f32 %v1537_v37, %v1117_v45 }
 0x189   : > { %v1541_v54 = vpop.eup %1540  ;;  %v1038_v55 = vadd.f32 1.0, %v1539_v51 }
 0x18a   : > { %v1122_v58 = vsel %vm1121_vm9, %v1537_v37, %v1118_v53  ;;  %v1130_v60 = vmul.f32 %v1541_v54, %v1037_v12  ;;  %vm1135_vm11 = vweird.f32 %v1541_v54 }
 0x18b   : > { %v1127_v62 = vsel %vm1124_vm10, %v1126_v24, %v1122_v58  ;;  %1542 = vrcp.f32 %v1038_v55  ;;  %vm1136_vm13 = vmor %vm1134_vm12, %vm1135_vm11  ;;  %v1155_v16 = vand.u32 2147483648, %v1038_v55  ;;  %v1153_v49 = vand.u32 2147483647, %v1038_v55 }
 0x18c   : > { %v1164_v36 = vmul.f32 %v1127_v62, %v1930_v0  ;;  %v1131_v63 = vsub.f32 1.0, %v1130_v60  ;;  %vm1149_vm0 = vweird.f32 %v1038_v55 }
 0x18d   : > { %v1156_v48 = vor.u32 1.1754944e-38, %v1155_v16  ;;  %vm1154_vm2 = vcmp.eq.f32.partialorder %v1153_v49, 8.507059e+37 }
 0x18e   : > { %1173 = vst.msk [vmem:[%s1919_s17 + $0x28] sm:$0xff] %vm1167_vm5, %v1164_v36  ;;  %v1132_v44 = vmul.f32 %v1541_v54, %v1131_v63 }
 0x190   : > { %v1133_v4 = vadd.f32 %v1541_v54, %v1132_v44 }
 0x191   : > { %v1543_v5 = vpop.eup %1542 }
 0x192   : > { %v1137_v6 = vsel %vm1136_vm13, %v1541_v54, %v1133_v4  ;;  %v1145_v8 = vmul.f32 %v1543_v5, %v1038_v55  ;;  %vm1150_vm15 = vweird.f32 %v1543_v5 }
 0x193   : > { %v1142_v20 = vsel %vm1139_vm14, %v1141_v1, %v1137_v6  ;;  %vm1151_vm1 = vmor %vm1149_vm0, %vm1150_vm15 }
 0x194   : > { %v1165_v0 = vmul.f32 %v1142_v20, %v1937_v17  ;;  %v1146_v10 = vsub.f32 1.0, %v1145_v8 }
 0x196   : > { %1174 = vst.msk [vmem:[%s1919_s17 + $0x30] sm:$0xff] %vm1167_vm5, %v1165_v0  ;;  %v1147_v13 = vmul.f32 %v1543_v5, %v1146_v10 }
 0x198   : > { %v1148_v18 = vadd.f32 %v1543_v5, %v1147_v13 }
 0x19a   : > { %v1152_v52 = vsel %vm1151_vm1, %v1543_v5, %v1148_v18 }
 0x19b   : > { %v1157_v14 = vsel %vm1154_vm2, %v1156_v48, %v1152_v52 }
 0x19c   : > { %v1166_v11 = vmul.f32 %v1157_v14, %v1944_v7 }
 0x19e   : > { %1175 = vst.msk [vmem:[%s1919_s17 + $0x38] sm:$0xff] %vm1167_vm5, %v1166_v11 }
 0x19f PF: > { %s19_s29 = sadd.s32 1, %s1550_s29  }
 0x1a0   : > { %p16_p4 = scmp.ge.s32.totalorder %s19_s29, 6  }
 0x1a2   :  { %18 = sbr.rel (!%p16_p4) target bundleno = 2 (0x2), region = 85 }

</bundles_post_ra>
